<compile_context>
chip_gen: v7x
topology: tpu7x:2x2x1
jax: 0.10.0
libtpu: 0.0.40
codegen_flags: <defaults>
</compile_context>

<pallas_src>
import functools
import math

import jax
import jax.numpy as jnp
import numpy as np
from jax.experimental import pallas as pl
from jax.experimental.pallas import tpu as pltpu


def _round_up(v, m):
    return ((v + m - 1) // m) * m


def _banded_conv_kernel(x_ref, w_ref, o_ref, *, K, stride, Ho, kh_group,
                        negative_slope, apply_act):
    """Whole (small) problem in one grid step.

    x_ref: (stride, N, Hd, LP)  bf16 row-parity decomposed, lane-dense input:
           x_ref[p, n, r, wcol*Cin + c] = x_pad[n, stride*r + p, wcol, c]
    w_ref: (K, LP, LPo)         bf16 banded weight, one plane per row tap kh:
           w_ref[kh, wcol*Cin + c, j*Cout + o] = w[o, c, kh, wcol - stride*j]
           (zero where wcol - stride*j is not in [0, K))
    o_ref: (N*Ho, LPo)          conv (+LeakyReLU) output rows, (j, cout) lanes
    """
    LP = x_ref.shape[-1]
    M, LPo = o_ref.shape

    def lhs(kh):
        # Row tap kh reads padded rows stride*i + kh, i.e. parity plane
        # kh % stride at decimated row offset kh // stride: a *contiguous*
        # sublane slice.  Merging (N, Ho) -> N*Ho is a leading-dim merge
        # (small sublane repack at most) — not the per-tap lane<->sublane
        # relayout rev2 paid 25 times.
        ph, ro = kh % stride, kh // stride
        return x_ref[ph, :, ro:ro + Ho, :].reshape(M, LP)

    # Group kh taps so each matmul sees a deep contraction (kh_group*LP = 256
    # lanes here, matching v6e/v7x's 256-deep MXU; 128-deep tail group).  The
    # lane concat of full-128-lane tiles is vreg placement, not masking.
    # All matmuls accumulate back-to-back into one f32 accumulator.
    acc = jnp.zeros((M, LPo), jnp.float32)
    for g0 in range(0, K, kh_group):
        khs = list(range(g0, min(g0 + kh_group, K)))
        a = jnp.concatenate([lhs(kh) for kh in khs], axis=-1)       # (M, n*LP)
        wg = w_ref[g0:g0 + len(khs)].reshape(len(khs) * LP, LPo)    # leading-dim merge
        acc += jnp.dot(a, wg, preferred_element_type=jnp.float32)

    if apply_act:
        acc = jnp.where(acc >= 0.0, acc, acc * negative_slope)
    o_ref[...] = acc.astype(o_ref.dtype)


def downsample_strided_conv2d(x, weight, *, stride=2, padding=True,
                              negative_slope=0.2, activation=True, kh_group=2):
    """x: [N, Cin, H, W] (NCHW), weight: [Cout, Cin, K, K] (PyTorch OIHW)."""
    N, Cin, H, W = x.shape
    Cout, Cin_w, K, K2 = weight.shape
    assert Cin == Cin_w and K == K2

    pad = (K // 2) if padding else 0
    Hp, Wp = H + 2 * pad, W + 2 * pad
    Ho = (Hp - K) // stride + 1
    Wo = (Wp - K) // stride + 1

    # Row-parity plane extent: in-kernel row offsets go up to (K-1)//stride.
    Hd = max(Ho + (K - 1) // stride, -(-Hp // stride))

    # Lane-dense minor dims: activations carry (wcol, cin) on lanes, outputs
    # carry (j, cout); each padded ONCE to a multiple of 128 so every vector
    # load/store is unmasked.  Real data fills the lanes (80 and 64 here).
    WpC = Wp * Cin
    LP = _round_up(WpC, 128)
    WoC = Wo * Cout
    LPo = _round_up(WoC, 128)
    M = N * Ho                      # batch folded into the matmul M dimension

    # ---- cheap XLA glue, ~1x data (no im2col / duplication) ----------------
    # NCHW -> NHWC, zero-pad, split rows by parity, flatten (wcol, cin) lanes.
    x_nhwc = jnp.transpose(x, (0, 2, 3, 1))
    x_pad = jnp.pad(x_nhwc, ((0, 0),
                             (pad, stride * Hd - Hp + pad),
                             (pad, pad),
                             (0, 0)))                      # (N, stride*Hd, Wp, Cin)
    xrp = x_pad.reshape(N, Hd, stride, Wp * Cin)
    xrp = jnp.transpose(xrp, (2, 0, 1, 3))                 # (stride, N, Hd, WpC)
    xrp = jnp.pad(xrp, ((0, 0), (0, 0), (0, 0), (0, LP - WpC))).astype(jnp.bfloat16)

    # Banded weight: one (WpC, Wo*Cout) plane per row tap kh, encoding the
    # column taps kw and the column stride.  Output column index j stays on
    # LANES, so the kernel never relayouts, and contraction per matmul is
    # LP (>= K*Cin) instead of Cin.
    P = np.zeros((Wp, Wo, K), np.float32)    # P[wcol, j, kw] = 1 iff wcol == stride*j + kw
    for j in range(Wo):
        for kw in range(K):
            P[stride * j + kw, j, kw] = 1.0
    w_r = jnp.transpose(weight, (2, 3, 1, 0))              # (kh, kw, cin, cout)
    wband = jnp.einsum('wjk,hkco->hwcjo', jnp.asarray(P), w_r)
    wband = wband.reshape(K, WpC, WoC)
    wband = jnp.pad(wband,
                    ((0, 0), (0, LP - WpC), (0, LPo - WoC))).astype(jnp.bfloat16)

    kernel = functools.partial(
        _banded_conv_kernel, K=K, stride=stride, Ho=Ho, kh_group=kh_group,
        negative_slope=negative_slope, apply_act=activation)

    # Single grid step: at these shapes the ~0.35us per-step pipeline overhead
    # would dominate the ~100 KFLOP of work, so both batch elements are one
    # MXU job (M = N*Ho rows) and the weight is DMA'd exactly once (no second
    # double-buffered copy).  Total VMEM use is a few tens of KiB, far under
    # any generation's scoped limit, so no vmem_limit_bytes override needed.
    # TODO(synk): for large H/W/C, add a "parallel" grid axis over output-row
    # bands (band + (K-1)//stride halo rows per parity plane) sized per
    # generation (<= ~32-48 MiB on v7x's 64 MiB VMEM, ~2x on v5e/v6e) so both
    # v7x TensorCores stay busy.
    out_flat = pl.pallas_call(
        kernel,
        out_shape=jax.ShapeDtypeStruct((M, LPo), x.dtype),
        grid=(1,),
        in_specs=[
            pl.BlockSpec((stride, N, Hd, LP), lambda i: (0, 0, 0, 0)),
            pl.BlockSpec((K, LP, LPo), lambda i: (0, 0, 0)),
        ],
        out_specs=pl.BlockSpec((M, LPo), lambda i: (0, 0)),
        compiler_params=pltpu.CompilerParams(
            dimension_semantics=("arbitrary",)),
    )(xrp, wband)

    out = out_flat[:, :WoC].reshape(N, Ho, Wo, Cout)
    return jnp.transpose(out, (0, 3, 1, 2))                # back to NCHW


def init_conv_weight(key, out_channels, in_channels, kernel_size, negative_slope):
    """kaiming_uniform_(a=negative_slope, nonlinearity='leaky_relu'), fan_in mode."""
    fan_in = in_channels * kernel_size * kernel_size
    gain = math.sqrt(2.0 / (1.0 + negative_slope ** 2))
    bound = gain * math.sqrt(3.0 / fan_in)
    shape = (out_channels, in_channels, kernel_size, kernel_size)
    return jax.random.uniform(key, shape, jnp.float32, minval=-bound, maxval=bound)


if __name__ == "__main__":
    key = jax.random.PRNGKey(0)
    k_x, k_w = jax.random.split(key)

    N, Cin, H, W = 2, 4, 16, 16
    Cout, K, stride, neg_slope = 8, 5, 2, 0.2

    x = jax.random.normal(k_x, (N, Cin, H, W), jnp.float32)
    w = init_conv_weight(k_w, Cout, Cin, K, neg_slope)

    fwd = jax.jit(functools.partial(
        downsample_strided_conv2d, stride=stride, padding=True,
        negative_slope=neg_slope, activation=True))
    y = jax.block_until_ready(fwd(x, w))

    # Reference (plain-JAX f32 conv + leaky relu), same semantics as PyTorch.
    # Kernel computes in bf16 with f32 accumulation -> relaxed tolerance.
    y_ref = jax.lax.conv_general_dilated(
        x, w, window_strides=(stride, stride),
        padding=[(K // 2, K // 2), (K // 2, K // 2)],
        dimension_numbers=("NCHW", "OIHW", "NCHW"))
    y_ref = jnp.where(y_ref >= 0.0, y_ref, y_ref * neg_slope)

    assert y.shape == (N, Cout, H // stride, W // stride), y.shape
    np.testing.assert_allclose(np.asarray(y), np.asarray(y_ref),
                               atol=5e-2, rtol=5e-2)

    print("KERNEL_OK")
</pallas_src>

<mosaic_0001>
module attributes {stable_mosaic.version = 11 : i64} {
  func.func @_banded_conv_kernel(%arg0: i32, %arg1: memref<2x2x10x128xbf16, #tpu.memory_space<vmem>>, %arg2: memref<5x128x128xbf16, #tpu.memory_space<vmem>>, %arg3: memref<16x128xf32, #tpu.memory_space<vmem>>) attributes {dimension_semantics = [#tpu.dimension_semantics<arbitrary>], iteration_bounds = array<i64: 1>, scalar_prefetch = 0 : i64, scratch_operands = 0 : i64, tpu.core_type = #tpu.core_type<tc>, window_params = [{pipeline_mode = #tpu.pipeline_mode<synchronous>, transform_indices = @transform_0, window_bounds = array<i64: 2, 2, 10, 128>}, {pipeline_mode = #tpu.pipeline_mode<synchronous>, transform_indices = @transform_1, window_bounds = array<i64: 5, 128, 128>}, {pipeline_mode = #tpu.pipeline_mode<synchronous>, transform_indices = @transform_2, window_bounds = array<i64: 16, 128>}]} {
    %cst = arith.constant 0.000000e+00 : f32
    %0 = vector.broadcast %cst : f32 to vector<16x128xf32>
    %c0 = arith.constant 0 : index
    %c0_0 = arith.constant 0 : index
    %c0_1 = arith.constant 0 : index
    %c0_2 = arith.constant 0 : index
    %1 = vector.load %arg1[%c0, %c0_0, %c0_1, %c0_2] : memref<2x2x10x128xbf16, #tpu.memory_space<vmem>>, vector<1x2x8x128xbf16>
    %2 = vector.shape_cast %1 : vector<1x2x8x128xbf16> to vector<2x8x128xbf16>
    %3 = vector.shape_cast %2 : vector<2x8x128xbf16> to vector<16x128xbf16>
    %c1 = arith.constant 1 : index
    %c0_3 = arith.constant 0 : index
    %c0_4 = arith.constant 0 : index
    %c0_5 = arith.constant 0 : index
    %4 = vector.load %arg1[%c1, %c0_3, %c0_4, %c0_5] : memref<2x2x10x128xbf16, #tpu.memory_space<vmem>>, vector<1x2x8x128xbf16>
    %5 = vector.shape_cast %4 : vector<1x2x8x128xbf16> to vector<2x8x128xbf16>
    %6 = vector.shape_cast %5 : vector<2x8x128xbf16> to vector<16x128xbf16>
    %7 = tpu.concatenate %3, %6 in 1 : vector<16x128xbf16>, vector<16x128xbf16> -> vector<16x256xbf16>
    %c0_6 = arith.constant 0 : index
    %c0_7 = arith.constant 0 : index
    %c0_8 = arith.constant 0 : index
    %8 = vector.load %arg2[%c0_6, %c0_7, %c0_8] : memref<5x128x128xbf16, #tpu.memory_space<vmem>>, vector<2x128x128xbf16>
    %9 = vector.shape_cast %8 : vector<2x128x128xbf16> to vector<256x128xbf16>
    %cst_9 = arith.constant dense<0.000000e+00> : vector<16x128xf32>
    %10 = tpu.matmul %7, %9, %cst_9 {dimension_numbers = #tpu.dot_dimension_numbers<[1], [0], [0], [1], [0, 0, 1, 1], [], []>} : vector<16x256xbf16>, vector<256x128xbf16>, vector<16x128xf32> -> vector<16x128xf32>
    %11 = arith.addf %0, %10 : vector<16x128xf32>
    %c0_10 = arith.constant 0 : index
    %c0_11 = arith.constant 0 : index
    %c1_12 = arith.constant 1 : index
    %c0_13 = arith.constant 0 : index
    %12 = vector.load %arg1[%c0_10, %c0_11, %c1_12, %c0_13] : memref<2x2x10x128xbf16, #tpu.memory_space<vmem>>, vector<1x2x8x128xbf16>
    %13 = vector.shape_cast %12 : vector<1x2x8x128xbf16> to vector<2x8x128xbf16>
    %14 = vector.shape_cast %13 : vector<2x8x128xbf16> to vector<16x128xbf16>
    %c1_14 = arith.constant 1 : index
    %c0_15 = arith.constant 0 : index
    %c1_16 = arith.constant 1 : index
    %c0_17 = arith.constant 0 : index
    %15 = vector.load %arg1[%c1_14, %c0_15, %c1_16, %c0_17] : memref<2x2x10x128xbf16, #tpu.memory_space<vmem>>, vector<1x2x8x128xbf16>
    %16 = vector.shape_cast %15 : vector<1x2x8x128xbf16> to vector<2x8x128xbf16>
    %17 = vector.shape_cast %16 : vector<2x8x128xbf16> to vector<16x128xbf16>
    %18 = tpu.concatenate %14, %17 in 1 : vector<16x128xbf16>, vector<16x128xbf16> -> vector<16x256xbf16>
    %c2 = arith.constant 2 : index
    %c0_18 = arith.constant 0 : index
    %c0_19 = arith.constant 0 : index
    %19 = vector.load %arg2[%c2, %c0_18, %c0_19] : memref<5x128x128xbf16, #tpu.memory_space<vmem>>, vector<2x128x128xbf16>
    %20 = vector.shape_cast %19 : vector<2x128x128xbf16> to vector<256x128xbf16>
    %cst_20 = arith.constant dense<0.000000e+00> : vector<16x128xf32>
    %21 = tpu.matmul %18, %20, %cst_20 {dimension_numbers = #tpu.dot_dimension_numbers<[1], [0], [0], [1], [0, 0, 1, 1], [], []>} : vector<16x256xbf16>, vector<256x128xbf16>, vector<16x128xf32> -> vector<16x128xf32>
    %22 = arith.addf %11, %21 : vector<16x128xf32>
    %c0_21 = arith.constant 0 : index
    %c0_22 = arith.constant 0 : index
    %c2_23 = arith.constant 2 : index
    %c0_24 = arith.constant 0 : index
    %23 = vector.load %arg1[%c0_21, %c0_22, %c2_23, %c0_24] : memref<2x2x10x128xbf16, #tpu.memory_space<vmem>>, vector<1x2x8x128xbf16>
    %24 = vector.shape_cast %23 : vector<1x2x8x128xbf16> to vector<2x8x128xbf16>
    %25 = vector.shape_cast %24 : vector<2x8x128xbf16> to vector<16x128xbf16>
    %c4 = arith.constant 4 : index
    %c0_25 = arith.constant 0 : index
    %c0_26 = arith.constant 0 : index
    %26 = vector.load %arg2[%c4, %c0_25, %c0_26] : memref<5x128x128xbf16, #tpu.memory_space<vmem>>, vector<1x128x128xbf16>
    %27 = vector.shape_cast %26 : vector<1x128x128xbf16> to vector<128x128xbf16>
    %cst_27 = arith.constant dense<0.000000e+00> : vector<16x128xf32>
    %28 = tpu.matmul %25, %27, %cst_27 {dimension_numbers = #tpu.dot_dimension_numbers<[1], [0], [0], [1], [0, 0, 1, 1], [], []>} : vector<16x128xbf16>, vector<128x128xbf16>, vector<16x128xf32> -> vector<16x128xf32>
    %29 = arith.addf %22, %28 : vector<16x128xf32>
    %cst_28 = arith.constant 0.000000e+00 : f32
    %30 = vector.broadcast %cst_28 : f32 to vector<16x128xf32>
    %31 = arith.cmpf oge, %29, %30 : vector<16x128xf32>
    %cst_29 = arith.constant 2.000000e-01 : f32
    %32 = vector.broadcast %cst_29 : f32 to vector<16x128xf32>
    %33 = arith.mulf %29, %32 : vector<16x128xf32>
    %34 = arith.select %31, %29, %33 : vector<16x128xi1>, vector<16x128xf32>
    %c0_30 = arith.constant 0 : index
    %c0_31 = arith.constant 0 : index
    %35 = vector.load %arg3[%c0_30, %c0_31] : memref<16x128xf32, #tpu.memory_space<vmem>>, vector<16x128xf32>
    tpu.vector_store %arg3[%c0_30, %c0_31], %34 {strides = array<i32>} : memref<16x128xf32, #tpu.memory_space<vmem>>, vector<16x128xf32>,
    return
  }
  func.func @transform_0(%arg0: i32) -> (i32, i32, i32, i32) {
    %c0_i32 = arith.constant 0 : i32
    %c0_i32_0 = arith.constant 0 : i32
    %c0_i32_1 = arith.constant 0 : i32
    %c0_i32_2 = arith.constant 0 : i32
    %c0_i32_3 = arith.constant 0 : i32
    return %c0_i32, %c0_i32_0, %c0_i32_1, %c0_i32_2 : i32, i32, i32, i32
  }
  func.func @transform_1(%arg0: i32) -> (i32, i32, i32) {
    %c0_i32 = arith.constant 0 : i32
    %c0_i32_0 = arith.constant 0 : i32
    %c0_i32_1 = arith.constant 0 : i32
    %c0_i32_2 = arith.constant 0 : i32
    return %c0_i32, %c0_i32_0, %c0_i32_1 : i32, i32, i32
  }
  func.func @transform_2(%arg0: i32) -> (i32, i32) {
    %c0_i32 = arith.constant 0 : i32
    %c0_i32_0 = arith.constant 0 : i32
    %c0_i32_1 = arith.constant 0 : i32
    return %c0_i32, %c0_i32_0 : i32, i32
  }
}

</mosaic_0001>

<bundles_post_ra>
// kernel: downsample_strided_conv2d.1
= control target key start
LH: loop header
LB: loop body
LE: loop exit
PB: predicated region body
PF: predicated region fallthrough
CT: control target
= control target key end

     0   :  { %vm63_vm0 = vsmask.f32 3328  ;;  %vm64_vm1 = vsmask.f32 7440  ;;  %v796_v39 = vmov 0.0   ;;  %vm797_vm3 = vmmov 0   ;;  %s1000_s1 = inlined_call_operand.vmem [shape: bf16[5,128,128], index: 1, kind: input, shape index: {}]   ;;  %s1001_s0 = inlined_call_operand.vmem [shape: bf16[2,2,10,128], index: 0, kind: input, shape index: {}]   ;;  %s1002_s2 = inlined_call_operand.vmem [shape: f32[16,128], index: 2, kind: output, shape index: {}]  }
   0x1   :  { %v754_v0 = vld [vmem:[%s1000_s1 + $0xc0] sm:$0xff]   ;;  %v758_v4 = vld [vmem:[%s1000_s1 + $0xc8] sm:$0xff]   ;;  %v762_v8 = vld [vmem:[%s1000_s1 + $0xd0] sm:$0xff]   ;;  %vm445_vm4 = vcmask 1042432   ;;  %vm446_vm5 = vcmask 1046532  }
   0x2   :  { %v755_v1 = vld [vmem:[%s1000_s1 + $0x40] sm:$0xff]   ;;  %679 = vmatprep.subr.bf16.mxu0 %v754_v0  ;;  %v759_v5 = vld [vmem:[%s1000_s1 + $0x48] sm:$0xff]   ;;  %v763_v9 = vld [vmem:[%s1000_s1 + $0x50] sm:$0xff]  }
   0x3   :  { %v756_v2 = vld [vmem:[%s1000_s1 + $0x80] sm:$0xff]   ;;  %701 = vmatprep.subr.bf16.mxu1 %v755_v1  ;;  %v760_v6 = vld [vmem:[%s1000_s1 + $0x88] sm:$0xff]   ;;  %v764_v10 = vld [vmem:[%s1000_s1 + $0x90] sm:$0xff]  }
   0x4   :  { %v757_v3 = vld [vmem:[%s1000_s1] sm:$0xff]   ;;  %680 = vmatpush3.bf16.msra.mxu0 %v756_v2  ;;  %v761_v7 = vld [vmem:[%s1000_s1 + $0x8] sm:$0xff]   ;;  %v765_v11 = vld [vmem:[%s1000_s1 + $0x10] sm:$0xff]  }
   0x5   :  { %702 = vmatpush3.bf16.msra.mxu1 %v757_v3  ;;  %681 = vmatprep.subr.bf16.mxu0 %v758_v4  ;;  %v766_v12 = vld [vmem:[%s1000_s1 + $0xd8] sm:$0xff]   ;;  %v770_v16 = vld [vmem:[%s1000_s1 + $0xe0] sm:$0xff]   ;;  %v774_v20 = vld [vmem:[%s1000_s1 + $0xe8] sm:$0xff]  }
   0x6   :  { %703 = vmatprep.subr.bf16.mxu1 %v759_v5  ;;  %v767_v13 = vld [vmem:[%s1000_s1 + $0x58] sm:$0xff]   ;;  %v771_v17 = vld [vmem:[%s1000_s1 + $0x60] sm:$0xff]   ;;  %v775_v21 = vld [vmem:[%s1000_s1 + $0x68] sm:$0xff]  }
   0x7   :  { %v768_v14 = vld [vmem:[%s1000_s1 + $0x98] sm:$0xff]   ;;  %v772_v18 = vld [vmem:[%s1000_s1 + $0xa0] sm:$0xff]   ;;  %v776_v22 = vld [vmem:[%s1000_s1 + $0xa8] sm:$0xff]  }
   0x8   :  { %682 = vmatpush3.bf16.msra.mxu0 %v760_v6  ;;  %v769_v15 = vld [vmem:[%s1000_s1 + $0x18] sm:$0xff]   ;;  %v773_v19 = vld [vmem:[%s1000_s1 + $0x20] sm:$0xff]   ;;  %v777_v23 = vld [vmem:[%s1000_s1 + $0x28] sm:$0xff]  }
   0x9   :  { %704 = vmatpush3.bf16.msra.mxu1 %v761_v7  ;;  %683 = vmatprep.subr.bf16.mxu0 %v762_v8  ;;  %v778_v24 = vld [vmem:[%s1000_s1 + $0xf0] sm:$0xff]   ;;  %v782_v28 = vld [vmem:[%s1000_s1 + $0xf8] sm:$0xff]   ;;  %v12_v44 = vld [vmem:[%s1001_s0] sm:$0xf] }
   0xa   :  { %705 = vmatprep.subr.bf16.mxu1 %v763_v9  ;;  %v779_v25 = vld [vmem:[%s1000_s1 + $0x70] sm:$0xff]   ;;  %v783_v29 = vld [vmem:[%s1000_s1 + $0x78] sm:$0xff]   ;;  %v13_v47 = vld [vmem:[%s1001_s0 + $0x8] sm:$0xf]  ;;  %v67_v55 = vshrl.u32 %v12_v44, 16  ;;  %v70_v56 = vshll.u32 %v12_v44, 16 }
   0xb   :  { %v780_v26 = vld [vmem:[%s1000_s1 + $0xb0] sm:$0xff]   ;;  %v784_v30 = vld [vmem:[%s1000_s1 + $0xb8] sm:$0xff]   ;;  %v931_v48 = vld [vmem:[%s1001_s0 + $0x4] sm:$0x1]  ;;  %v81_v60 = vshrl.u32 %v13_v47, 16  ;;  %v84_v61 = vshll.u32 %v13_v47, 16 }
   0xc   :  { %684 = vmatpush3.bf16.msra.mxu0 %v764_v10  ;;  %v781_v27 = vld [vmem:[%s1000_s1 + $0x30] sm:$0xff]   ;;  %v785_v31 = vld [vmem:[%s1000_s1 + $0x38] sm:$0xff]   ;;  %v936_v53 = vld [vmem:[%s1001_s0 + $0xc] sm:$0x1]  ;;  %v76_v57 = vshll.u32 %v931_v48, 16  ;;  %v69_v0 = vrot.slane %v67_v55, 4 }
   0xd   :  { %706 = vmatpush3.bf16.msra.mxu1 %v765_v11  ;;  %685 = vmatprep.subr.bf16.mxu0 %v766_v12  ;;  %v580_v32 = vld [vmem:[%s1001_s0 + $0x10] sm:$0xf]  ;;  %v581_v33 = vld [vmem:[%s1001_s0 + $0x18] sm:$0xf]  ;;  %v584_v34 = vld [vmem:[%s1001_s0 + $0x14] sm:$0x1]  ;;  %v582_v11 = vcombine.low %v12_v44, %v13_v47 }
   0xe   :  { %707 = vmatprep.subr.bf16.mxu1 %v767_v13  ;;  %v585_v35 = vld [vmem:[%s1001_s0 + $0x1c] sm:$0x1]  ;;  %v97_v36 = vshrl.u32 %v580_v32, 16  ;;  %v100_v37 = vshll.u32 %v580_v32, 16  ;;  %v583_v38 = vcombine.low %v580_v32, %v581_v33  ;;  %v106_v40 = vshll.u32 %v584_v34, 16  ;;  %vm941_vm2 = vmor %vm63_vm0, %vm64_vm1 }
   0xf   :  { %v111_v41 = vshrl.u32 %v581_v33, 16  ;;  %v114_v42 = vshll.u32 %v581_v33, 16  ;;  %v120_v43 = vshll.u32 %v585_v35, 16  ;;  %v90_v62 = vshll.u32 %v936_v53, 16  ;;  %vm447_vm6 = vmor %vm445_vm4, %vm446_vm5 }
  0x10   :  { %686 = vmatpush3.bf16.msra.mxu0 %v768_v14  ;;  %v99_v45 = vrot.slane %v97_v36, 4  ;;  %v102_v46 = vrot.slane %v100_v37, 5  ;;  %430 = vmatprep.mubr.bf16.mxu1 %v583_v38  ;;  %v108_v49 = vrot.slane %v106_v40, 5  ;;  %v72_v1 = vrot.slane %v70_v56, 5 }
  0x11   :  { %708 = vmatpush3.bf16.msra.mxu1 %v769_v15  ;;  %687 = vmatprep.subr.bf16.mxu0 %v770_v16  ;;  %v113_v50 = vrot.slane %v111_v41, 4  ;;  %v116_v51 = vrot.slane %v114_v42, 5  ;;  %v122_v52 = vrot.slane %v120_v43, 5  ;;  %v83_v3 = vrot.slane %v81_v60, 4 }
  0x12   :  { %709 = vmatprep.subr.bf16.mxu1 %v771_v17  ;;  %v103_v54 = vor.u32 %v102_v46, %v99_v45  ;;  %v86_v4 = vrot.slane %v84_v61, 5  ;;  %v73_v6 = vor.u32 %v72_v1, %v69_v0  ;;  %v78_v7 = vrot.slane %v76_v57, 5  ;;  %v788_v17 = vld [vmem:[%s1000_s1 + $0x100] sm:$0xff]  }
  0x13   :  { %v117_v59 = vor.u32 %v116_v51, %v113_v50  ;;  %v92_v10 = vrot.slane %v90_v62, 5 }
  0x14   :  { %688 = vmatpush3.bf16.msra.mxu0 %v772_v18  ;;  %v104_v63 = vrot.slane %v103_v54, 4  ;;  %v87_v9 = vor.u32 %v86_v4, %v83_v3  ;;  %v74_v13 = vrot.slane %v73_v6, 4 }
  0x15   :  { %710 = vmatpush3.bf16.msra.mxu1 %v773_v19  ;;  %689 = vmatprep.subr.bf16.mxu0 %v774_v20  ;;  %v118_v2 = vrot.slane %v117_v59, 4  ;;  %v789_v19 = vld [vmem:[%s1000_s1 + $0x108] sm:$0xff]   ;;  %v790_v20 = vld [vmem:[%s1000_s1 + $0x110] sm:$0xff]  }
  0x16   :  { %711 = vmatprep.subr.bf16.mxu1 %v775_v21  ;;  %v109_v5 = vsel %vm941_vm2, %v104_v63, %v108_v49  ;;  %v88_v14 = vrot.slane %v87_v9, 4  ;;  %v79_v15 = vsel %vm941_vm2, %v74_v13, %v78_v7  ;;  %v791_v21 = vld [vmem:[%s1000_s1 + $0x118] sm:$0xff]  }
  0x17   :  { %v123_v8 = vsel %vm941_vm2, %v118_v2, %v122_v52 }
  0x18   :  { %690 = vmatpush3.bf16.msra.mxu0 %v776_v22  ;;  %v587_v12 = vcombine.low %v109_v5, %v123_v8  ;;  %v93_v16 = vsel %vm941_vm2, %v88_v14, %v92_v10  ;;  %v792_v22 = vld [vmem:[%s1000_s1 + $0x120] sm:$0xff]  }
  0x19   :  { %712 = vmatpush3.bf16.msra.mxu1 %v777_v23  ;;  %691 = vmatprep.subr.bf16.mxu0 %v778_v24  ;;  %v586_v18 = vcombine.low %v79_v15, %v93_v16  ;;  %v793_v23 = vld [vmem:[%s1000_s1 + $0x128] sm:$0xff]   ;;  %v439_v24 = vld [vmem:[%s1001_s0] sm:$0xe] }
  0x1a   :  { %713 = vmatprep.subr.bf16.mxu1 %v779_v25  ;;  %293 = vmatprep.mubr.bf16.mxu0 %v587_v12  ;;  %v440_v25 = vld [vmem:[%s1001_s0 + $0x8] sm:$0xe] }
  0x1c   :  { %692 = vmatpush3.bf16.msra.mxu0 %v780_v26  ;;  %v450_v26 = vrot.slane %v931_v48, 5 }
  0x1d   :  { %714 = vmatpush3.bf16.msra.mxu1 %v781_v27  ;;  %693 = vmatprep.subr.bf16.mxu0 %v782_v28  ;;  %v454_v27 = vrot.slane %v936_v53, 5  ;;  %v794_v28 = vld [vmem:[%s1000_s1 + $0x130] sm:$0xff]  }
  0x1e   :  { %715 = vmatprep.subr.bf16.mxu1 %v783_v29  ;;  %v652_v29 = vrot.slane %v439_v24, 9 }
  0x20   :  { %694 = vmatpush3.bf16.msra.mxu0 %v784_v30  ;;  %v653_v30 = vrot.slane %v440_v25, 9  ;;  %v451_v32 = vsel %vm447_vm6, %v652_v29, %v450_v26 }
  0x21   :  { %716 = vmatpush3.bf16.msra.mxu1 %v785_v31  ;;  %732 = vmatprep.subr.bf16.mxu0 %v796_v39  ;;  %v795_v31 = vld [vmem:[%s1000_s1 + $0x138] sm:$0xff]  }
  0x22   :  { %v455_v33 = vsel %vm447_vm6, %v653_v30, %v454_v27 }
  0x23   :  { %294 = vmatmul.mubr.bf16.vlgmr.msra.gmra.mrb[0].mxu0 %v586_v18  ;;  %v670_v34 = vcombine.low %v451_v32, %v455_v33 }
  0x24   :  { %431 = vmatmul.mubr.bf16.vlgmr.msra.gmra.mrb[0].mxu1 %v582_v11  ;;  %733 = vmatpush3.bf16.msra.mxu0 %v788_v17 }
  0x25   :  { %748 = vmatprep.mubr.msk.bf16.mxu0 %vm797_vm3, %v796_v39  ;;  %734 = vmatprep.subr.bf16.mxu0 %v796_v39 }
  0x28   :  { %735 = vmatpush3.bf16.msra.mxu0 %v789_v19 }
  0x29   :  { %736 = vmatprep.subr.bf16.mxu0 %v796_v39 }
  0x2c   :  { %737 = vmatpush3.bf16.msra.mxu0 %v790_v20 }
  0x2d   :  { %738 = vmatprep.subr.bf16.mxu0 %v796_v39 }
  0x30   :  { %739 = vmatpush3.bf16.msra.mxu0 %v791_v21 }
  0x31   :  { %740 = vmatprep.subr.bf16.mxu0 %v796_v39 }
  0x34   :  { %741 = vmatpush3.bf16.msra.mxu0 %v792_v22 }
  0x35   :  { %742 = vmatprep.subr.bf16.mxu0 %v796_v39 }
  0x38   :  { %743 = vmatpush3.bf16.msra.mxu0 %v793_v23 }
  0x39   :  { %744 = vmatprep.subr.bf16.mxu0 %v796_v39 }
  0x3c   :  { %745 = vmatpush3.bf16.msra.mxu0 %v794_v28 }
  0x3d   :  { %746 = vmatprep.subr.bf16.mxu0 %v796_v39 }
  0x40   :  { %747 = vmatpush3.bf16.msra.mxu0 %v795_v31 }
  0x43   :  { %749 = vmatmul.mubr.bf16.vlgmr.msra.gmra.mrb[4].mxu0 %v670_v34 }
  0xf6   :  { %v695_v42 = vpop.f32.mrb[0].mxu0 }
  0xf7   :  { %v717_v35 = vpop.f32.mrb[0].mxu1  ;;  %v696_v43 = vpop.f32.mrb[1].mxu0 }
  0xf8   :  { %v718_v36 = vpop.f32.mrb[1].mxu1  ;;  %v697_v44 = vadd.f32 %v696_v43, %v695_v42  ;;  %v698_v45 = vpop.f32.mrb[2].mxu0 }
  0xf9   :  { %v719_v37 = vadd.f32 %v718_v36, %v717_v35  ;;  %v720_v38 = vpop.f32.mrb[2].mxu1  ;;  %v699_v46 = vpop.f32.mrb[3].mxu0 }
  0xfa   :  { %v721_v40 = vpop.f32.mrb[3].mxu1  ;;  %v700_v47 = vadd.f32 %v699_v46, %v698_v45 }
  0xfb   :  { %v722_v41 = vadd.f32 %v721_v40, %v720_v38  ;;  %v433_v48 = vadd.f32 %v719_v37, %v697_v44 }
  0xfd   :  { %v436_v49 = vadd.f32 %v722_v41, %v700_v47 }
 0x116   :  { %v559_v50 = vpop.f32.mrb[4].mxu0 }
 0x117   :  { %v566_v51 = vadd.f32 %v559_v50, %v433_v48  ;;  %v750_v39 = vpop.f32.mrb[5].mxu0 }
 0x118   :  { %v562_v52 = vpop.f32.mrb[6].mxu0 }
 0x119   :  { %vm568_vm7 = vcmp.ge.f32.partialorder %v566_v51, 0.0  ;;  %v570_v53 = vmul.f32 0.2, %v566_v51  ;;  %v567_v54 = vadd.f32 %v562_v52, %v436_v49  ;;  %v751_v55 = vpop.f32.mrb[7].mxu0 }
 0x11b   :  { %v572_v56 = vsel %vm568_vm7, %v566_v51, %v570_v53  ;;  %vm569_vm8 = vcmp.ge.f32.partialorder %v567_v54, 0.0  ;;  %v571_v57 = vmul.f32 0.2, %v567_v54 }
 0x11c   :  { %574 = vst [vmem:[%s1002_s2] sm:$0xff] %v572_v56 }
 0x11d   :  { %v573_v58 = vsel %vm569_vm8, %v567_v54, %v571_v57 }
 0x11e   :  { %575 = vst [vmem:[%s1002_s2 + $0x8] sm:$0xff] %v573_v58 }

</bundles_post_ra>
